<compile_context>
chip_gen: v6e
topology: v6e:2x2x1
jax: 0.10.0
libtpu: 0.0.40
codegen_flags: <defaults>
</compile_context>

<pallas_src>
import functools

import jax
import jax.numpy as jnp
from jax import lax
from jax.experimental import pallas as pl
from jax.experimental.pallas import tpu as pltpu


# ----------------------------- helpers --------------------------------------
def _round_up(x, m):
    return ((x + m - 1) // m) * m


def _softplus(x):
    # Numerically stable log1p(exp(x)) = max(x, 0) + log1p(exp(-|x|)).
    return jnp.maximum(x, 0.0) + jnp.log1p(jnp.exp(-jnp.abs(x)))


# --------------------------- fused Pallas kernel ------------------------------
def _fused_bayes_conv_kernel(mu_w_ref, rho_w_ref, eps_w_ref,
                             mu_b_ref, rho_b_ref, eps_b_ref,
                             x_ref, o_ref, *, shifts, l_out):
    """One grid step = one image.

    Reparameterizes W/b in-kernel (tiny; recomputed per step, lands in idle VPU/EUP
    slots), then computes the conv as kh*kw shifted-window matmuls over the flattened
    padded image:  out[:, p] = sum_k W_k @ x_flat[:, p + shift_k].
    """
    # --- reparameterization (f32 math, then bf16 operands for the MXU) ---
    w = mu_w_ref[...] + _softplus(rho_w_ref[...]) * eps_w_ref[...]      # (KK, Cout, Cin) f32
    wb = w.astype(jnp.bfloat16)
    b = mu_b_ref[...] + _softplus(rho_b_ref[...]) * eps_b_ref[...]      # (Cout, 1) f32

    cout = o_ref.shape[1]
    acc = jnp.zeros((cout, l_out), jnp.float32)
    for k, off in enumerate(shifts):                                    # static unroll (kh*kw)
        xs = x_ref[0, :, pl.ds(off, l_out)]                             # (Cin, l_out) bf16
        acc = acc + jnp.dot(wb[k], xs, preferred_element_type=jnp.float32)

    o_ref[0, :, :] = (acc + b).astype(o_ref.dtype)


# ------------------------------- JAX wrapper ----------------------------------
def bayes_conv2d(x, mu_w, rho_w, eps_w, mu_b, rho_b, eps_b,
                 stride=1, padding=0, dilation=1):
    """Bayesian conv2d forward (reparameterization). x: NCHW, weights: OIHW. Returns NCHW."""
    N, Cin, H, W = x.shape
    Cout, Cin_g, kh, kw = mu_w.shape
    assert Cin_g == Cin, "groups != 1 not supported"  # TODO(synk): grouped conv

    Hp, Wp = H + 2 * padding, W + 2 * padding
    kh_eff = (kh - 1) * dilation + 1
    kw_eff = (kw - 1) * dilation + 1
    Ho = (Hp - kh_eff) // stride + 1
    Wo = (Wp - kw_eff) // stride + 1

    # Dense "flat-shift" geometry: compute the conv at every top-left-corner row
    # 0..(Ho-1)*stride over the full padded width; wrap-around/stride-skipped columns are
    # garbage and are discarded by the (tiny) post-kernel slice.
    rows_dense = (Ho - 1) * stride + 1
    L_out = rows_dense * Wp
    max_shift = (kh - 1) * dilation * Wp + (kw - 1) * dilation
    L_in = _round_up(Hp * Wp + max_shift, 128)           # lane-dense input stream

    # Wrapper prep on x: one spatial pad + flatten + flat zero-extend + bf16 cast.
    xp = jnp.pad(x, ((0, 0), (0, 0), (padding, padding), (padding, padding)))
    xflat = jnp.pad(xp.reshape(N, Cin, Hp * Wp),
                    ((0, 0), (0, 0), (0, L_in - Hp * Wp))).astype(jnp.bfloat16)

    KK = kh * kw
    shifts = tuple(i * dilation * Wp + j * dilation for i in range(kh) for j in range(kw))

    def to_kk(w):   # (Cout, Cin, kh, kw) -> (KK, Cout, Cin); negligible XLA work.
        return jnp.transpose(w, (2, 3, 0, 1)).reshape(KK, Cout, Cin)

    def to_col(v):  # (Cout,) -> (Cout, 1)
        return v.reshape(Cout, 1)

    kernel = functools.partial(_fused_bayes_conv_kernel, shifts=shifts, l_out=L_out)

    out_dense = pl.pallas_call(
        kernel,
        out_shape=jax.ShapeDtypeStruct((N, Cout, L_out), x.dtype),
        grid_spec=pltpu.PrefetchScalarGridSpec(
            num_scalar_prefetch=0,
            grid=(N,),
            in_specs=[
                pl.BlockSpec((KK, Cout, Cin), lambda n: (0, 0, 0)),   # mu_w  (resident)
                pl.BlockSpec((KK, Cout, Cin), lambda n: (0, 0, 0)),   # rho_w (resident)
                pl.BlockSpec((KK, Cout, Cin), lambda n: (0, 0, 0)),   # eps_w (resident)
                pl.BlockSpec((Cout, 1), lambda n: (0, 0)),            # mu_b  (resident)
                pl.BlockSpec((Cout, 1), lambda n: (0, 0)),            # rho_b (resident)
                pl.BlockSpec((Cout, 1), lambda n: (0, 0)),            # eps_b (resident)
                pl.BlockSpec((1, Cin, L_in), lambda n: (n, 0, 0)),    # x, one image / step
            ],
            out_specs=pl.BlockSpec((1, Cout, L_out), lambda n: (n, 0, 0)),
        ),
        compiler_params=pltpu.CompilerParams(
            dimension_semantics=("parallel",)),
    )(to_kk(mu_w), to_kk(rho_w), to_kk(eps_w),
      to_col(mu_b), to_col(rho_b), to_col(eps_b), xflat)

    # (N, Cout, rows_dense, Wp): keep strided rows / valid strided cols -> NCHW directly,
    # no transpose, and the sliced array is only a few KB (no 16x padded re-read).
    out = out_dense.reshape(N, Cout, rows_dense, Wp)
    out = out[:, :, ::stride, : (Wo - 1) * stride + 1 : stride]
    return out


# --------------------------- pure-JAX references ------------------------------
def _reference(x, mu_w, rho_w, eps_w, mu_b, rho_b, eps_b,
               stride, padding, dilation, operand_dtype=jnp.float32):
    w = mu_w + _softplus(rho_w) * eps_w
    b = mu_b + _softplus(rho_b) * eps_b
    out = lax.conv_general_dilated(
        x.astype(operand_dtype), w.astype(operand_dtype),
        window_strides=(stride, stride),
        padding=[(padding, padding), (padding, padding)],
        rhs_dilation=(dilation, dilation),
        dimension_numbers=("NCHW", "OIHW", "NCHW"),
        preferred_element_type=jnp.float32)
    return out + b[None, :, None, None]


# ----------------------------------- main ------------------------------------
if __name__ == "__main__":
    # Module config (Conv2d variant of BaseConvLayer_, layer_type="reparameterization")
    in_channels, out_channels = 4, 8
    kernel_size = (3, 3)
    stride, padding, dilation = 1, 1, 1
    posterior_mu_init, posterior_rho_init = 0.0, -3.0

    N, H, W = 2, 16, 16

    key = jax.random.PRNGKey(0)
    k_x, k_muw, k_epsw, k_mub, k_epsb = jax.random.split(key, 5)

    # Deterministic parameter init (mirrors init_parameters(): mu ~ N(0, 0.1), rho = -3).
    # TODO(synk): per-forward eps resampling / flipout branch / frozen-state RNG are
    # host-side stateful-RNG concerns; here eps is passed in as a fixed sample.
    w_shape = (out_channels, in_channels, *kernel_size)
    mu_w = 0.1 * jax.random.normal(k_muw, w_shape, jnp.float32) + posterior_mu_init
    rho_w = jnp.full(w_shape, posterior_rho_init, jnp.float32)
    eps_w = jax.random.normal(k_epsw, w_shape, jnp.float32)

    mu_b = 0.1 * jax.random.normal(k_mub, (out_channels,), jnp.float32) + posterior_mu_init
    rho_b = jnp.full((out_channels,), posterior_rho_init, jnp.float32)
    eps_b = jax.random.normal(k_epsb, (out_channels,), jnp.float32)

    x = jax.random.normal(k_x, (N, in_channels, H, W), jnp.float32)  # NCHW

    out = bayes_conv2d(x, mu_w, rho_w, eps_w, mu_b, rho_b, eps_b,
                       stride=stride, padding=padding, dilation=dilation)
    out = jax.block_until_ready(out)
    assert out.shape == (N, out_channels, H, W)

    # Tight check: same semantics with bf16 MXU operands (matches the kernel's arithmetic).
    ref_bf16 = _reference(x, mu_w, rho_w, eps_w, mu_b, rho_b, eps_b,
                          stride, padding, dilation, operand_dtype=jnp.bfloat16)
    assert jnp.allclose(out, ref_bf16, atol=5e-3, rtol=5e-3), "mismatch vs bf16-operand ref"

    # Loose sanity check vs full-f32 module semantics (difference = bf16 operand rounding).
    ref_f32 = _reference(x, mu_w, rho_w, eps_w, mu_b, rho_b, eps_b,
                         stride, padding, dilation, operand_dtype=jnp.float32)
    assert jnp.allclose(out, ref_f32, atol=5e-2, rtol=5e-2), "mismatch vs f32 reference conv"

    print("KERNEL_OK")
</pallas_src>

<mosaic_0001>
module attributes {stable_mosaic.version = 11 : i64} {
  func.func @_fused_bayes_conv_kernel(%arg0: i32, %arg1: memref<9x8x4xf32, #tpu.memory_space<vmem>>, %arg2: memref<9x8x4xf32, #tpu.memory_space<vmem>>, %arg3: memref<9x8x4xf32, #tpu.memory_space<vmem>>, %arg4: memref<8x1xf32, #tpu.memory_space<vmem>>, %arg5: memref<8x1xf32, #tpu.memory_space<vmem>>, %arg6: memref<8x1xf32, #tpu.memory_space<vmem>>, %arg7: memref<1x4x384xbf16, #tpu.memory_space<vmem>>, %arg8: memref<1x8x288xf32, #tpu.memory_space<vmem>>) attributes {dimension_semantics = [#tpu.dimension_semantics<parallel>], iteration_bounds = array<i64: 2>, scalar_prefetch = 0 : i64, scratch_operands = 0 : i64, tpu.core_type = #tpu.core_type<tc>, window_params = [{pipeline_mode = #tpu.pipeline_mode<synchronous>, transform_indices = @transform_0, window_bounds = array<i64: 9, 8, 4>}, {pipeline_mode = #tpu.pipeline_mode<synchronous>, transform_indices = @transform_1, window_bounds = array<i64: 9, 8, 4>}, {pipeline_mode = #tpu.pipeline_mode<synchronous>, transform_indices = @transform_2, window_bounds = array<i64: 9, 8, 4>}, {pipeline_mode = #tpu.pipeline_mode<synchronous>, transform_indices = @transform_3, window_bounds = array<i64: 8, 1>}, {pipeline_mode = #tpu.pipeline_mode<synchronous>, transform_indices = @transform_4, window_bounds = array<i64: 8, 1>}, {pipeline_mode = #tpu.pipeline_mode<synchronous>, transform_indices = @transform_5, window_bounds = array<i64: 8, 1>}, {transform_indices = @transform_6, window_bounds = array<i64: 1, 4, 384>}, {transform_indices = @transform_7, window_bounds = array<i64: 1, 8, 288>}]} {
    %c0 = arith.constant 0 : index
    %c0_0 = arith.constant 0 : index
    %c0_1 = arith.constant 0 : index
    %0 = vector.load %arg1[%c0, %c0_0, %c0_1] : memref<9x8x4xf32, #tpu.memory_space<vmem>>, vector<9x8x4xf32>
    %c0_2 = arith.constant 0 : index
    %c0_3 = arith.constant 0 : index
    %c0_4 = arith.constant 0 : index
    %1 = vector.load %arg2[%c0_2, %c0_3, %c0_4] : memref<9x8x4xf32, #tpu.memory_space<vmem>>, vector<9x8x4xf32>
    %cst = arith.constant 0.000000e+00 : f32
    %2 = vector.broadcast %cst : f32 to vector<9x8x4xf32>
    %3 = arith.maximumf %1, %2 : vector<9x8x4xf32>
    %4 = math.absf %1 : vector<9x8x4xf32>
    %cst_5 = arith.constant 0.000000e+00 : f32
    %5 = vector.broadcast %cst_5 : f32 to vector<9x8x4xf32>
    %6 = arith.subf %5, %4 : vector<9x8x4xf32>
    %7 = math.exp %6 : vector<9x8x4xf32>
    %8 = math.log1p %7 : vector<9x8x4xf32>
    %9 = arith.addf %3, %8 : vector<9x8x4xf32>
    %c0_6 = arith.constant 0 : index
    %c0_7 = arith.constant 0 : index
    %c0_8 = arith.constant 0 : index
    %10 = vector.load %arg3[%c0_6, %c0_7, %c0_8] : memref<9x8x4xf32, #tpu.memory_space<vmem>>, vector<9x8x4xf32>
    %11 = arith.mulf %9, %10 : vector<9x8x4xf32>
    %12 = arith.addf %0, %11 : vector<9x8x4xf32>
    %13 = arith.truncf %12 : vector<9x8x4xf32> to vector<9x8x4xbf16>
    %c0_9 = arith.constant 0 : index
    %c0_10 = arith.constant 0 : index
    %14 = vector.load %arg4[%c0_9, %c0_10] : memref<8x1xf32, #tpu.memory_space<vmem>>, vector<8x1xf32>
    %c0_11 = arith.constant 0 : index
    %c0_12 = arith.constant 0 : index
    %15 = vector.load %arg5[%c0_11, %c0_12] : memref<8x1xf32, #tpu.memory_space<vmem>>, vector<8x1xf32>
    %cst_13 = arith.constant 0.000000e+00 : f32
    %16 = vector.broadcast %cst_13 : f32 to vector<8x1xf32>
    %17 = arith.maximumf %15, %16 : vector<8x1xf32>
    %18 = math.absf %15 : vector<8x1xf32>
    %cst_14 = arith.constant 0.000000e+00 : f32
    %19 = vector.broadcast %cst_14 : f32 to vector<8x1xf32>
    %20 = arith.subf %19, %18 : vector<8x1xf32>
    %21 = math.exp %20 : vector<8x1xf32>
    %22 = math.log1p %21 : vector<8x1xf32>
    %23 = arith.addf %17, %22 : vector<8x1xf32>
    %c0_15 = arith.constant 0 : index
    %c0_16 = arith.constant 0 : index
    %24 = vector.load %arg6[%c0_15, %c0_16] : memref<8x1xf32, #tpu.memory_space<vmem>>, vector<8x1xf32>
    %25 = arith.mulf %23, %24 : vector<8x1xf32>
    %26 = arith.addf %14, %25 : vector<8x1xf32>
    %cst_17 = arith.constant 0.000000e+00 : f32
    %27 = vector.broadcast %cst_17 : f32 to vector<8x288xf32>
    %c0_18 = arith.constant 0 : index
    %c0_19 = arith.constant 0 : index
    %c0_20 = arith.constant 0 : index
    %28 = vector.load %arg7[%c0_18, %c0_19, %c0_20] : memref<1x4x384xbf16, #tpu.memory_space<vmem>>, vector<1x4x288xbf16>
    %29 = vector.shape_cast %28 : vector<1x4x288xbf16> to vector<4x288xbf16>
    %30 = vector.extract_strided_slice %13 {offsets = [0, 0, 0], sizes = [1, 8, 4], strides = [1, 1, 1]} : vector<9x8x4xbf16> to vector<1x8x4xbf16>
    %31 = vector.shape_cast %30 : vector<1x8x4xbf16> to vector<8x4xbf16>
    %cst_21 = arith.constant dense<0.000000e+00> : vector<8x288xf32>
    %32 = tpu.matmul %31, %29, %cst_21 {dimension_numbers = #tpu.dot_dimension_numbers<[1], [0], [0], [1], [0, 0, 1, 1], [], []>} : vector<8x4xbf16>, vector<4x288xbf16>, vector<8x288xf32> -> vector<8x288xf32>
    %33 = arith.addf %27, %32 : vector<8x288xf32>
    %c0_22 = arith.constant 0 : index
    %c0_23 = arith.constant 0 : index
    %c1 = arith.constant 1 : index
    %34 = vector.load %arg7[%c0_22, %c0_23, %c1] : memref<1x4x384xbf16, #tpu.memory_space<vmem>>, vector<1x4x288xbf16>
    %35 = vector.shape_cast %34 : vector<1x4x288xbf16> to vector<4x288xbf16>
    %36 = vector.extract_strided_slice %13 {offsets = [1, 0, 0], sizes = [1, 8, 4], strides = [1, 1, 1]} : vector<9x8x4xbf16> to vector<1x8x4xbf16>
    %37 = vector.shape_cast %36 : vector<1x8x4xbf16> to vector<8x4xbf16>
    %cst_24 = arith.constant dense<0.000000e+00> : vector<8x288xf32>
    %38 = tpu.matmul %37, %35, %cst_24 {dimension_numbers = #tpu.dot_dimension_numbers<[1], [0], [0], [1], [0, 0, 1, 1], [], []>} : vector<8x4xbf16>, vector<4x288xbf16>, vector<8x288xf32> -> vector<8x288xf32>
    %39 = arith.addf %33, %38 : vector<8x288xf32>
    %c0_25 = arith.constant 0 : index
    %c0_26 = arith.constant 0 : index
    %c2 = arith.constant 2 : index
    %40 = vector.load %arg7[%c0_25, %c0_26, %c2] : memref<1x4x384xbf16, #tpu.memory_space<vmem>>, vector<1x4x288xbf16>
    %41 = vector.shape_cast %40 : vector<1x4x288xbf16> to vector<4x288xbf16>
    %42 = vector.extract_strided_slice %13 {offsets = [2, 0, 0], sizes = [1, 8, 4], strides = [1, 1, 1]} : vector<9x8x4xbf16> to vector<1x8x4xbf16>
    %43 = vector.shape_cast %42 : vector<1x8x4xbf16> to vector<8x4xbf16>
    %cst_27 = arith.constant dense<0.000000e+00> : vector<8x288xf32>
    %44 = tpu.matmul %43, %41, %cst_27 {dimension_numbers = #tpu.dot_dimension_numbers<[1], [0], [0], [1], [0, 0, 1, 1], [], []>} : vector<8x4xbf16>, vector<4x288xbf16>, vector<8x288xf32> -> vector<8x288xf32>
    %45 = arith.addf %39, %44 : vector<8x288xf32>
    %c0_28 = arith.constant 0 : index
    %c0_29 = arith.constant 0 : index
    %c18 = arith.constant 18 : index
    %46 = vector.load %arg7[%c0_28, %c0_29, %c18] : memref<1x4x384xbf16, #tpu.memory_space<vmem>>, vector<1x4x288xbf16>
    %47 = vector.shape_cast %46 : vector<1x4x288xbf16> to vector<4x288xbf16>
    %48 = vector.extract_strided_slice %13 {offsets = [3, 0, 0], sizes = [1, 8, 4], strides = [1, 1, 1]} : vector<9x8x4xbf16> to vector<1x8x4xbf16>
    %49 = vector.shape_cast %48 : vector<1x8x4xbf16> to vector<8x4xbf16>
    %cst_30 = arith.constant dense<0.000000e+00> : vector<8x288xf32>
    %50 = tpu.matmul %49, %47, %cst_30 {dimension_numbers = #tpu.dot_dimension_numbers<[1], [0], [0], [1], [0, 0, 1, 1], [], []>} : vector<8x4xbf16>, vector<4x288xbf16>, vector<8x288xf32> -> vector<8x288xf32>
    %51 = arith.addf %45, %50 : vector<8x288xf32>
    %c0_31 = arith.constant 0 : index
    %c0_32 = arith.constant 0 : index
    %c19 = arith.constant 19 : index
    %52 = vector.load %arg7[%c0_31, %c0_32, %c19] : memref<1x4x384xbf16, #tpu.memory_space<vmem>>, vector<1x4x288xbf16>
    %53 = vector.shape_cast %52 : vector<1x4x288xbf16> to vector<4x288xbf16>
    %54 = vector.extract_strided_slice %13 {offsets = [4, 0, 0], sizes = [1, 8, 4], strides = [1, 1, 1]} : vector<9x8x4xbf16> to vector<1x8x4xbf16>
    %55 = vector.shape_cast %54 : vector<1x8x4xbf16> to vector<8x4xbf16>
    %cst_33 = arith.constant dense<0.000000e+00> : vector<8x288xf32>
    %56 = tpu.matmul %55, %53, %cst_33 {dimension_numbers = #tpu.dot_dimension_numbers<[1], [0], [0], [1], [0, 0, 1, 1], [], []>} : vector<8x4xbf16>, vector<4x288xbf16>, vector<8x288xf32> -> vector<8x288xf32>
    %57 = arith.addf %51, %56 : vector<8x288xf32>
    %c0_34 = arith.constant 0 : index
    %c0_35 = arith.constant 0 : index
    %c20 = arith.constant 20 : index
    %58 = vector.load %arg7[%c0_34, %c0_35, %c20] : memref<1x4x384xbf16, #tpu.memory_space<vmem>>, vector<1x4x288xbf16>
    %59 = vector.shape_cast %58 : vector<1x4x288xbf16> to vector<4x288xbf16>
    %60 = vector.extract_strided_slice %13 {offsets = [5, 0, 0], sizes = [1, 8, 4], strides = [1, 1, 1]} : vector<9x8x4xbf16> to vector<1x8x4xbf16>
    %61 = vector.shape_cast %60 : vector<1x8x4xbf16> to vector<8x4xbf16>
    %cst_36 = arith.constant dense<0.000000e+00> : vector<8x288xf32>
    %62 = tpu.matmul %61, %59, %cst_36 {dimension_numbers = #tpu.dot_dimension_numbers<[1], [0], [0], [1], [0, 0, 1, 1], [], []>} : vector<8x4xbf16>, vector<4x288xbf16>, vector<8x288xf32> -> vector<8x288xf32>
    %63 = arith.addf %57, %62 : vector<8x288xf32>
    %c0_37 = arith.constant 0 : index
    %c0_38 = arith.constant 0 : index
    %c36 = arith.constant 36 : index
    %64 = vector.load %arg7[%c0_37, %c0_38, %c36] : memref<1x4x384xbf16, #tpu.memory_space<vmem>>, vector<1x4x288xbf16>
    %65 = vector.shape_cast %64 : vector<1x4x288xbf16> to vector<4x288xbf16>
    %66 = vector.extract_strided_slice %13 {offsets = [6, 0, 0], sizes = [1, 8, 4], strides = [1, 1, 1]} : vector<9x8x4xbf16> to vector<1x8x4xbf16>
    %67 = vector.shape_cast %66 : vector<1x8x4xbf16> to vector<8x4xbf16>
    %cst_39 = arith.constant dense<0.000000e+00> : vector<8x288xf32>
    %68 = tpu.matmul %67, %65, %cst_39 {dimension_numbers = #tpu.dot_dimension_numbers<[1], [0], [0], [1], [0, 0, 1, 1], [], []>} : vector<8x4xbf16>, vector<4x288xbf16>, vector<8x288xf32> -> vector<8x288xf32>
    %69 = arith.addf %63, %68 : vector<8x288xf32>
    %c0_40 = arith.constant 0 : index
    %c0_41 = arith.constant 0 : index
    %c37 = arith.constant 37 : index
    %70 = vector.load %arg7[%c0_40, %c0_41, %c37] : memref<1x4x384xbf16, #tpu.memory_space<vmem>>, vector<1x4x288xbf16>
    %71 = vector.shape_cast %70 : vector<1x4x288xbf16> to vector<4x288xbf16>
    %72 = vector.extract_strided_slice %13 {offsets = [7, 0, 0], sizes = [1, 8, 4], strides = [1, 1, 1]} : vector<9x8x4xbf16> to vector<1x8x4xbf16>
    %73 = vector.shape_cast %72 : vector<1x8x4xbf16> to vector<8x4xbf16>
    %cst_42 = arith.constant dense<0.000000e+00> : vector<8x288xf32>
    %74 = tpu.matmul %73, %71, %cst_42 {dimension_numbers = #tpu.dot_dimension_numbers<[1], [0], [0], [1], [0, 0, 1, 1], [], []>} : vector<8x4xbf16>, vector<4x288xbf16>, vector<8x288xf32> -> vector<8x288xf32>
    %75 = arith.addf %69, %74 : vector<8x288xf32>
    %c0_43 = arith.constant 0 : index
    %c0_44 = arith.constant 0 : index
    %c38 = arith.constant 38 : index
    %76 = vector.load %arg7[%c0_43, %c0_44, %c38] : memref<1x4x384xbf16, #tpu.memory_space<vmem>>, vector<1x4x288xbf16>
    %77 = vector.shape_cast %76 : vector<1x4x288xbf16> to vector<4x288xbf16>
    %78 = vector.extract_strided_slice %13 {offsets = [8, 0, 0], sizes = [1, 8, 4], strides = [1, 1, 1]} : vector<9x8x4xbf16> to vector<1x8x4xbf16>
    %79 = vector.shape_cast %78 : vector<1x8x4xbf16> to vector<8x4xbf16>
    %cst_45 = arith.constant dense<0.000000e+00> : vector<8x288xf32>
    %80 = tpu.matmul %79, %77, %cst_45 {dimension_numbers = #tpu.dot_dimension_numbers<[1], [0], [0], [1], [0, 0, 1, 1], [], []>} : vector<8x4xbf16>, vector<4x288xbf16>, vector<8x288xf32> -> vector<8x288xf32>
    %81 = arith.addf %75, %80 : vector<8x288xf32>
    %82 = vector.broadcast %26 : vector<8x1xf32> to vector<8x288xf32>
    %83 = arith.addf %81, %82 : vector<8x288xf32>
    %c0_46 = arith.constant 0 : index
    %c0_47 = arith.constant 0 : index
    %c0_48 = arith.constant 0 : index
    %84 = vector.load %arg8[%c0_46, %c0_47, %c0_48] : memref<1x8x288xf32, #tpu.memory_space<vmem>>, vector<1x8x288xf32>
    %85 = vector.shape_cast %84 : vector<1x8x288xf32> to vector<8x288xf32>
    %86 = vector.shape_cast %83 : vector<8x288xf32> to vector<1x8x288xf32>
    tpu.vector_store %arg8[%c0_46, %c0_47, %c0_48], %86 {strides = array<i32>} : memref<1x8x288xf32, #tpu.memory_space<vmem>>, vector<1x8x288xf32>,
    return
  }
  func.func @transform_0(%arg0: i32) -> (i32, i32, i32) {
    %c0_i32 = arith.constant 0 : i32
    %c0_i32_0 = arith.constant 0 : i32
    %c0_i32_1 = arith.constant 0 : i32
    %c0_i32_2 = arith.constant 0 : i32
    return %c0_i32, %c0_i32_0, %c0_i32_1 : i32, i32, i32
  }
  func.func @transform_1(%arg0: i32) -> (i32, i32, i32) {
    %c0_i32 = arith.constant 0 : i32
    %c0_i32_0 = arith.constant 0 : i32
    %c0_i32_1 = arith.constant 0 : i32
    %c0_i32_2 = arith.constant 0 : i32
    return %c0_i32, %c0_i32_0, %c0_i32_1 : i32, i32, i32
  }
  func.func @transform_2(%arg0: i32) -> (i32, i32, i32) {
    %c0_i32 = arith.constant 0 : i32
    %c0_i32_0 = arith.constant 0 : i32
    %c0_i32_1 = arith.constant 0 : i32
    %c0_i32_2 = arith.constant 0 : i32
    return %c0_i32, %c0_i32_0, %c0_i32_1 : i32, i32, i32
  }
  func.func @transform_3(%arg0: i32) -> (i32, i32) {
    %c0_i32 = arith.constant 0 : i32
    %c0_i32_0 = arith.constant 0 : i32
    %c0_i32_1 = arith.constant 0 : i32
    return %c0_i32, %c0_i32_0 : i32, i32
  }
  func.func @transform_4(%arg0: i32) -> (i32, i32) {
    %c0_i32 = arith.constant 0 : i32
    %c0_i32_0 = arith.constant 0 : i32
    %c0_i32_1 = arith.constant 0 : i32
    return %c0_i32, %c0_i32_0 : i32, i32
  }
  func.func @transform_5(%arg0: i32) -> (i32, i32) {
    %c0_i32 = arith.constant 0 : i32
    %c0_i32_0 = arith.constant 0 : i32
    %c0_i32_1 = arith.constant 0 : i32
    return %c0_i32, %c0_i32_0 : i32, i32
  }
  func.func @transform_6(%arg0: i32) -> (i32, i32, i32) {
    %c0_i32 = arith.constant 0 : i32
    %c0_i32_0 = arith.constant 0 : i32
    %c0_i32_1 = arith.constant 0 : i32
    return %arg0, %c0_i32, %c0_i32_0 : i32, i32, i32
  }
  func.func @transform_7(%arg0: i32) -> (i32, i32, i32) {
    %c0_i32 = arith.constant 0 : i32
    %c0_i32_0 = arith.constant 0 : i32
    %c0_i32_1 = arith.constant 0 : i32
    return %arg0, %c0_i32, %c0_i32_0 : i32, i32, i32
  }
}

</mosaic_0001>

<bundles_post_ra>
// kernel: tpu_custom_call.1
= control target key start
LH: loop header
LB: loop body
LE: loop exit
PB: predicated region body
PF: predicated region fallthrough
CT: control target
= control target key end

     0   :  { %12 = vsyncpa [#allocation3], 0  ;;  %s2427_s0 = inlined_call_operand.vmem [shape: f32[9,8,4], index: 0, kind: input, shape index: {}]   ;;  %s2428_s1 = inlined_call_operand.vmem [shape: f32[9,8,4], index: 1, kind: input, shape index: {}]   ;;  %s2429_s2 = inlined_call_operand.vmem [shape: f32[9,8,4], index: 2, kind: input, shape index: {}]   ;;  %s2430_s3 = inlined_call_operand.vmem [shape: f32[8,1], index: 3, kind: input, shape index: {}]   ;;  %s2431_s4 = inlined_call_operand.vmem [shape: f32[8,1], index: 4, kind: input, shape index: {}]   ;;  %s2432_s5 = inlined_call_operand.vmem [shape: f32[8,1], index: 5, kind: input, shape index: {}]   ;;  %s2433_s6 = inlined_call_operand.vmem [shape: bf16[2,4,384], index: 6, kind: input, shape index: {}]   ;;  %s2434_s7 = inlined_call_operand.hbm [shape: f32[2,8,288], index: 7, kind: output, shape index: {}]  }
   0x1   :  { %14 = vsyncpa [#allocation3 + $0x1], 0  ;;  %s1974_s24 = smov 0   ;;  %s1976_s25 = smov 0  }
   0x2   :  { %s1978_s26 = smov 0   ;;  %s1980_s27 = smov 0  }
   0x3 LB: > { %s1995_s28 = sadd.s32 4294967295, %s1919_s27   ;;  %s1649_s29 = sadd.s32 4294967294, %s1919_s27   ;;  %s1919_s27 = sphi %s1980_s27, %s2456_s27   ;;  %s1915_s26 = sphi %s1978_s26, %s2455_s26   ;;  %s1911_s25 = sphi %s1976_s25, %s2454_s25   ;;  %s1907_s24 = sphi %s1974_s24, %s2453_s24  }
   0x4   : > { %s1999_s30 = sadd.s32 1, %s1919_s27   ;;  %s179_s8 = sadd.s32 1, %s1915_s26 }
   0x5   : > { %s176_s9 = ssub.s32 %s1919_s27, %s1999_s30  ;;  %p189_p0 = scmp.ne.s32.totalorder %s1915_s26, %s1911_s25 }
   0x6   : > { %p177_p1 = scmp.eq.s32.totalorder %s176_s9, 0  ;;  %p190_p2 = scmp.eq.s32.totalorder %s1995_s28, 1 }
   0x7   : > { %p195_p3 = scmp.ne.s32.totalorder %s1911_s25, %s1907_s24  ;;  %p196_p4 = scmp.eq.s32.totalorder %s1649_s29, 1 }
   0x8   : > { %s2010_s10 = scalar_select %p177_p1, %s1915_s26, %s179_s8  }
   0x9   : > { %p2012_p5 = por %p190_p2, %p189_p0  ;;  %p2016_p6 = por %p196_p4, %p195_p3 }
   0xa   : > { %p1652_p7 = scmp.ge.s32.totalorder %s1919_s27, 1  ;;  %p240_p8 = scmp.lt.s32.totalorder %s1919_s27, 3 }
   0xc   : > { %p241_p9 = pnand %p1652_p7, %p240_p8 }
   0xd   : > { %p272_p10 = scmp.lt.s32.totalorder (!%p241_p9), %s1995_s28, 1  ;;  %s1925_s18 = smov (!%p241_p9), 127  }
   0xe   : > { %244 = sbr.rel (%p241_p9) target bundleno = 428 (0x1ac), region = 48  ;;  %s1926_s19 = smov (!%p241_p9), 126  }
   0xf   : > { %s1927_s20 = smov (!%p241_p9), 110   ;;  %s1928_s21 = smov (!%p241_p9), 109  }
  0x10   : > { %s1929_s22 = smov (!%p241_p9), 108   ;;  %s1930_s23 = smov (!%p241_p9), 92  }
  0x11   : > { %s1931_s29 = smov (!%p241_p9), 91   ;;  %s1932_s8 = smov (!%p241_p9), 90  }
  0x12   : > { %s269_s16 = sand.u32 (!%p241_p9), 1, %s1911_s25  }
  0x13   : > { %v493_v0 = vlaneseq  ;;  %v1921_v1 = vmov 1983009808   ;;  %v1922_v3 = vmov 0.0   ;;  %s273_s13 = scalar_select %p272_p10, %s1995_s28, 1  ;;  %vm1923_vm0 = vmmov 0   ;;  %v2074_v48 = vld [vmem:[%s2428_s1 + $0x8] sm:$0xff] }
  0x14   : > { %v491_v2 = vunpack.c.l.s4 %v1921_v1  ;;  %1702 = vmatprep.subr.bf16.mxu1 %v1922_v3  ;;  %1704 = vmatprep.mubr.msk.bf16.mxu1 %vm1923_vm0, %v1922_v3  ;;  %v1924_v6 = vmov 0   ;;  %v306_v49 = vand.u32 2147483647, %v2074_v48  ;;  %v2080_v51 = vld [vmem:[%s2428_s1] sm:$0xff]  ;;  %v2089_v57 = vld [vmem:[%s2428_s1 + $0x10] sm:$0xff]  ;;  %v2095_v63 = vld [vmem:[%s2428_s1 + $0x18] sm:$0xff] }
  0x15   : > { %v494_v4 = vshrl.u32 %v493_v0, 7  ;;  %s1757_s14 = smul.u32 6, %s273_s13  ;;  %560 = vmatprep.mubr.bf16.mxu0 %v1924_v6  ;;  %1810 = vset.pattern.permute.xlu0 %v1924_v6  ;;  %v305_v53 = vand.u32 2147483647, %v2080_v51  ;;  %v468_v54 = vld [vmem:[%s2431_s4] sm:$0xff]  ;;  %vm518_vm4 = vcmask 1041408  }
  0x16   : > { %v492_v5 = vunpack.c.0.s8 %v491_v2  ;;  %v315_v50 = vsub.f32 0.0, %v306_v49  ;;  %v470_v55 = vand.u32 2147483647, %v468_v54  ;;  %v307_v61 = vand.u32 2147483647, %v2089_v57  ;;  %v467_v49 = vld [vmem:[%s2430_s3] sm:$0xff] }
  0x17   : > { %s2034_s17 = scalar_lea.vmem %s2433_s6, %s1757_s14  ;;  %v314_v56 = vsub.f32 0.0, %v305_v53  ;;  %v308_v1 = vand.u32 2147483647, %v2095_v63  ;;  %vm511_vm6 = vcmask 1039360   ;;  %vm514_vm7 = vcmask 31744  }
  0x18   : > { %v2029_v7 = vsub.s32 %v492_v5, %v494_v4  ;;  %v487_v8 = vld [vmem:[%s2034_s17] sm:$0x3f]  ;;  %v325_v52 = vmul.f32 1.442695, %v315_v50  ;;  %v471_v58 = vsub.f32 0.0, %v470_v55  ;;  %v316_v62 = vsub.f32 0.0, %v307_v61 }
  0x19   : > { %v489_v10 = vcombine.high %v487_v8, %v487_v8  ;;  %v702_v11 = vld [vmem:[%s2034_s17] sm:$0x3f]  ;;  %v323_v60 = vmul.f32 1.442695, %v314_v56  ;;  %v317_v5 = vsub.f32 0.0, %v308_v1  ;;  %vm726_vm8 = vcmask 1031168  }
  0x1a   : > { %v2038_v9 = vrot.slane %v487_v8, %v2029_v7  ;;  %v711_v14 = vrot.slane %v702_v11, %v2029_v7  ;;  %v704_v15 = vcombine.high %v702_v11, %v702_v11  ;;  %v825_v17 = vld [vmem:[%s2034_s17] sm:$0x3f]  ;;  %1819 = vpow2.f32 %v325_v52 }
  0x1b   : > { %v2043_v12 = vrot.slane %v489_v10, %v2029_v7  ;;  %v834_v19 = vrot.slane %v825_v17, %v2029_v7  ;;  %v827_v20 = vcombine.high %v825_v17, %v825_v17  ;;  %v948_v22 = vld [vmem:[%s2034_s17] sm:$0x3f]  ;;  %v472_v59 = vmul.f32 1.442695, %v471_v58 }
  0x1c   : > { %505 = vrot.lane.b32.xlu0 %v2038_v9, %s1925_s18  ;;  %v2047_v13 = vcombine.high %v2038_v9, %v2038_v9  ;;  %v719_v16 = vcombine.high %v711_v14, %v711_v14  ;;  %v718_v18 = vrot.slane %v704_v15, %v2029_v7  ;;  %v957_v24 = vrot.slane %v948_v22, %v2029_v7  ;;  %v1071_v27 = vld [vmem:[%s2034_s17] sm:$0x3f] }
  0x1d   : > { %509 = vrot.lane.b32.xlu1 %v2043_v12, %s1925_s18  ;;  %v842_v21 = vcombine.high %v834_v19, %v834_v19  ;;  %v841_v23 = vrot.slane %v827_v20, %v2029_v7  ;;  %v950_v25 = vcombine.high %v948_v22, %v948_v22  ;;  %v1080_v29 = vrot.slane %v1071_v27, %v2029_v7  ;;  %v1194_v32 = vld [vmem:[%s2034_s17] sm:$0x3f] }
  0x1e   : > { %v965_v26 = vcombine.high %v957_v24, %v957_v24  ;;  %v1073_v30 = vcombine.high %v1071_v27, %v1071_v27  ;;  %v1203_v34 = vrot.slane %v1194_v32, %v2029_v7  ;;  %v1196_v35 = vcombine.high %v1194_v32, %v1194_v32  ;;  %v1317_v37 = vld [vmem:[%s2034_s17] sm:$0x3f] }
  0x1f   : > { %v964_v28 = vrot.slane %v950_v25, %v2029_v7  ;;  %v1088_v31 = vcombine.high %v1080_v29, %v1080_v29  ;;  %v1326_v39 = vrot.slane %v1317_v37, %v2029_v7  ;;  %v1319_v40 = vcombine.high %v1317_v37, %v1317_v37  ;;  %v1440_v42 = vld [vmem:[%s2034_s17] sm:$0x3f]  ;;  %s1756_s17 = smul.u32 24, %s269_s16 }
  0x20   : > { %507 = vrot.lane.b32.xlu0 %v2047_v13, %s1925_s18  ;;  %v1087_v33 = vrot.slane %v1073_v30, %v2029_v7  ;;  %v1211_v36 = vcombine.high %v1203_v34, %v1203_v34  ;;  %v1210_v38 = vrot.slane %v1196_v35, %v2029_v7  ;;  %v1449_v44 = vrot.slane %v1440_v42, %v2029_v7  ;;  %s1758_s18 = smul.u32 384, %s1995_s28  ;;  %s1576_s28 = scalar_lea.sflag [#allocation3], %s269_s16 }
  0x21   : > { %720 = vrot.lane.b32.xlu1 %v711_v14, %s1926_s19  ;;  %v1334_v41 = vcombine.high %v1326_v39, %v1326_v39  ;;  %v1333_v43 = vrot.slane %v1319_v40, %v2029_v7  ;;  %v1442_v45 = vcombine.high %v1440_v42, %v1440_v42  ;;  %1821 = vpow2.f32 %v472_v59 }
  0x22   : > { %v1457_v46 = vcombine.high %v1449_v44, %v1449_v44  ;;  %1823 = vpow2.f32 %v323_v60  ;;  %v327_v0 = vmul.f32 1.442695, %v316_v62  ;;  %v329_v11 = vmul.f32 1.442695, %v317_v5  ;;  %v432_v62 = vld [vmem:[%s2429_s2 + $0x8] sm:$0xff] }
  0x23   : > { %v1456_v47 = vrot.slane %v1442_v45, %v2029_v7  ;;  %v2101_v7 = vld [vmem:[%s2428_s1 + $0x20] sm:$0xff]  ;;  %vm849_vm10 = vcmask 900096   ;;  %vm972_vm12 = vcmask 891904   ;;  %vm1095_vm14 = vcmask 883712  }
  0x24   : > { %722 = vrot.lane.b32.xlu0 %v719_v16, %s1926_s19  ;;  %1825 = vpow2.f32 %v327_v0  ;;  %v309_v14 = vand.u32 2147483647, %v2101_v7 }
  0x25   : > { %724 = vrot.lane.b32.xlu1 %v718_v18, %s1926_s19  ;;  %v2107_v18 = vld [vmem:[%s2428_s1 + $0x28] sm:$0xff]  ;;  %s271_s19 = scalar_lea.vmem [#allocation2], %s1756_s17 }
  0x26   : > { %v318_v17 = vsub.f32 0.0, %v309_v14  ;;  %v310_v20 = vand.u32 2147483647, %v2107_v18 }
  0x27   : > { %v1820_v2 = vpop.eup %1819 }
  0x28   : > { %843 = vrot.lane.b32.xlu0 %v834_v19, %s1927_s20  ;;  %v350_v4 = vadd.f32 1.0, %v1820_v2  ;;  %v331_v22 = vmul.f32 1.442695, %v318_v17 }
  0x29   : > { %845 = vrot.lane.b32.xlu1 %v842_v21, %s1927_s20  ;;  %v353_v21 = vmul.f32 -0.5, %v1820_v2 }
  0x2a   : > { %1827 = vlog2.f32 %v350_v4 }
  0x2b   : > { %v354_v27 = vadd.f32 1.0, %v353_v21 }
  0x2c   : > { %847 = vrot.lane.b32.xlu0 %v841_v23, %s1927_s20  ;;  %s1590_s20 = sshll.u32 %s271_s19, 4  ;;  %s1591_s20 = int_to_ptr.vmem [resolvable:$true] %s1590_s20 }
  0x2d   : > { %966 = vrot.lane.b32.xlu1 %v957_v24, %s1928_s21 }
  0x2e   : > { %v1822_v8 = vpop.eup %1821 }
  0x2f   : > { %v474_v10 = vadd.f32 1.0, %v1822_v8  ;;  %v1824_v15 = vpop.eup %1823  ;;  %v477_v19 = vmul.f32 -0.5, %v1822_v8  ;;  %v480_v25 = vand.u32 2147483647, %v1822_v8 }
  0x30   : > { %968 = vrot.lane.b32.xlu0 %v965_v26, %s1928_s21  ;;  %v341_v16 = vadd.f32 1.0, %v1824_v15  ;;  %v319_v26 = vsub.f32 0.0, %v310_v20  ;;  %v344_v40 = vmul.f32 -0.5, %v1824_v15 }
  0x31   : > { %970 = vrot.lane.b32.xlu1 %v964_v28, %s1928_s21  ;;  %1829 = vlog2.f32 %v474_v10  ;;  %v2110_v23 = vpop.eup %1825  ;;  %v478_v24 = vadd.f32 1.0, %v477_v19  ;;  %vm481_vm1 = vcmp.lt.f32.partialorder %v480_v25, 0.0004427343 }
  0x32   : > { %1831 = vpow2.f32 %v329_v11  ;;  %v359_v28 = vadd.f32 1.0, %v2110_v23  ;;  %v333_v35 = vmul.f32 1.442695, %v319_v26  ;;  %v345_v52 = vadd.f32 1.0, %v344_v40  ;;  %v279_v11 = vld [vmem:[%s2427_s0 + $0x8] sm:$0xff] }
  0x33   : > { %1833 = vlog2.f32 %v341_v16  ;;  %v479_v32 = vmul.f32 %v1822_v8, %v478_v24  ;;  %v296_v8 = vmax.f32 %v2080_v51, 0.0  ;;  %v365_v20 = vand.u32 2147483647, %v2110_v23 }
  0x34   : > { %1089 = vrot.lane.b32.xlu0 %v1080_v29, %s1929_s22  ;;  %1835 = vpow2.f32 %v331_v22  ;;  %v2116_v29 = vld [vmem:[%s2428_s1 + $0x30] sm:$0xff]  ;;  %v346_v1 = vmul.f32 %v1824_v15, %v345_v52 }
  0x35   : > { %1091 = vrot.lane.b32.xlu1 %v1088_v31, %s1929_s22  ;;  %v356_v31 = vand.u32 2147483647, %v1820_v2  ;;  %1837 = vlog2.f32 %v359_v28  ;;  %vm2166_vm5 = vcmp.lt.f32.partialorder %v365_v20, 0.0004427343 }
  0x36   : > { %1839 = vpow2.f32 %v333_v35 }
  0x37   : > { %v1828_v30 = vpop.eup %1827  ;;  %vm2121_vm2 = vcmp.lt.f32.partialorder %v356_v31, 0.0004427343 }
  0x38   : > { %1093 = vrot.lane.b32.xlu0 %v1087_v33, %s1929_s22 }
  0x39   : > { %1212 = vrot.lane.b32.xlu1 %v1203_v34, %s1930_s23  ;;  %v469_v34 = vmax.f32 %v468_v54, 0.0  ;;  %v2138_v54 = vld [vmem:[%s2428_s1 + $0x38] sm:$0xff] }
  0x3a   : > { %v312_v61 = vand.u32 2147483647, %v2138_v54 }
  0x3c   : > { %1214 = vrot.lane.b32.xlu0 %v1211_v36, %s1930_s23  ;;  %v311_v36 = vand.u32 2147483647, %v2116_v29  ;;  %v321_v10 = vsub.f32 0.0, %v312_v61 }
  0x3d   : > { %1216 = vrot.lane.b32.xlu1 %v1210_v38, %s1930_s23  ;;  %v352_v38 = vmul.f32 0.6931472, %v1828_v30  ;;  %s2390_s23 = scalar_lea.hbm %s2434_s7, %s1758_s18 }
  0x3e   : > { %v1830_v33 = vpop.eup %1829  ;;  %v337_v22 = vmul.f32 1.442695, %v321_v10 }
  0x3f   : > { %v476_v37 = vmul.f32 0.6931472, %v1830_v33 }
  0x40   : > { %1335 = vrot.lane.b32.xlu0 %v1326_v39, %s1931_s29  ;;  %v355_v39 = vmul.f32 %v1820_v2, %v354_v27  ;;  %v362_v2 = vmul.f32 -0.5, %v2110_v23  ;;  %v431_v27 = vld [vmem:[%s2429_s2] sm:$0xff] }
  0x41   : > { %1337 = vrot.lane.b32.xlu1 %v1334_v41, %s1931_s29  ;;  %v2119_v41 = vpop.eup %1831 }
  0x42   : > { %v358_v50 = vsel %vm2121_vm2, %v355_v39, %v352_v38  ;;  %v368_v53 = vadd.f32 1.0, %v2119_v41  ;;  %v1834_v56 = vpop.eup %1833  ;;  %v363_v16 = vadd.f32 1.0, %v362_v2  ;;  %v371_v31 = vmul.f32 -0.5, %v2119_v41 }
  0x43   : > { %v343_v0 = vmul.f32 0.6931472, %v1834_v56  ;;  %v2145_v4 = vpop.eup %1835 }
  0x44   : > { %1339 = vrot.lane.b32.xlu0 %v1333_v43, %s1931_s29  ;;  %v482_v43 = vsel %vm481_vm1, %v479_v32, %v476_v37  ;;  %1841 = vlog2.f32 %v368_v53  ;;  %v377_v17 = vadd.f32 1.0, %v2145_v4  ;;  %v1838_v19 = vpop.eup %1837  ;;  %v364_v30 = vmul.f32 %v2110_v23, %v363_v16  ;;  %v278_v23 = vld [vmem:[%s2427_s0] sm:$0xff]  ;;  %s1859_s29 = scalar_lea.vmem %s1591_s20, 384 }
  0x45   : > { %1458 = vrot.lane.b32.xlu1 %v1449_v44, %s1932_s8  ;;  %v484_v44 = vld [vmem:[%s2432_s5] sm:$0xff]  ;;  %v483_v45 = vadd.f32 %v482_v43, %v469_v34  ;;  %v2159_v25 = vpop.eup %1839  ;;  %v361_v28 = vmul.f32 0.6931472, %v1838_v19  ;;  %v298_v34 = vmax.f32 %v2089_v57, 0.0  ;;  %v372_v42 = vadd.f32 1.0, %v371_v31  ;;  %p1860_p11 = scmp.ne.s32.totalorder %s1591_s20, %s1859_s29 }
  0x46   : > { %v386_v43 = vadd.f32 1.0, %v2159_v25  ;;  %vm1218_vm1 = vcmask 752640  }
  0x47   : > { %v485_v55 = vmul.f32 %v484_v44, %v483_v45  ;;  %v367_v40 = vsel %vm2166_vm5, %v364_v30, %v361_v28  ;;  %p1861_p12 = pnand %p1860_p11, %p2012_p5 }
  0x48   : > { %1460 = vrot.lane.b32.xlu0 %v1457_v46, %s1932_s8  ;;  %v297_v46 = vmax.f32 %v2074_v48, 0.0  ;;  %v347_v48 = vand.u32 2147483647, %v1824_v15  ;;  %v2155_v15 = vld [vmem:[%s2428_s1 + $0x40] sm:$0xff] }
  0x49   : > { %1462 = vrot.lane.b32.xlu1 %v1456_v47, %s1932_s8  ;;  %v320_v47 = vsub.f32 0.0, %v311_v36  ;;  %v486_v58 = vadd.f32 %v485_v55, %v467_v49  ;;  %v313_v24 = vand.u32 2147483647, %v2155_v15  ;;  %v424_v55 = vadd.f32 %v367_v40, %v298_v34  ;;  %p1862_p13 = pneg %p1861_p12  ;;  %s1933_s8 = smov [#allocation2]  }
  0x4a   : > { %v423_v59 = vadd.f32 %v358_v50, %v297_v46  ;;  %vm348_vm3 = vcmp.lt.f32.partialorder %v347_v48, 0.0004427343  ;;  %v619_v46 = vsel %vm518_vm4, %v2043_v12, 0  ;;  %v613_v50 = vsel %vm518_vm4, %v2038_v9, 0  ;;  %v433_v48 = vld [vmem:[%s2429_s2 + $0x10] sm:$0xff]  ;;  %s1863_s9 = sshll.u32 %s1933_s8, 4  ;;  %s1864_s9 = int_to_ptr.vmem [resolvable:$false] %s1863_s9 }
  0x4b   : > { %v335_v60 = vmul.f32 1.442695, %v320_v47  ;;  %v349_v14 = vsel %vm348_vm3, %v346_v1, %v343_v0  ;;  %v322_v38 = vsub.f32 0.0, %v313_v24  ;;  %v374_v47 = vand.u32 2147483647, %v2119_v41  ;;  %s1865_s13 = scalar_lea.vmem %s1864_s9, 768  ;;  %p1866_p0 = scmp.lt.s32.totalorder %s1591_s20, %s1864_s9 }
  0x4c   : > { %1565 = vperm.xlu0 %1810, %v486_v58   ;;  %v441_v5 = vmul.f32 %v432_v62, %v423_v59  ;;  %v422_v21 = vadd.f32 %v349_v14, %v296_v8  ;;  %v373_v9 = vmul.f32 %v2119_v41, %v372_v42  ;;  %v380_v59 = vmul.f32 -0.5, %v2145_v4  ;;  %p1867_p1 = scmp.lt.s32.totalorder %s1865_s13, %s1859_s29 }
  0x4d   : > { %1843 = vpow2.f32 %v335_v60  ;;  %v339_v56 = vmul.f32 1.442695, %v322_v38  ;;  %vm2201_vm9 = vcmp.lt.f32.partialorder %v374_v47, 0.0004427343  ;;  %v442_v0 = vmul.f32 %v433_v48, %v424_v55 }
  0x4e   : > { %v450_v51 = vadd.f32 %v441_v5, %v279_v11  ;;  %1845 = vlog2.f32 %v377_v17  ;;  %v440_v37 = vmul.f32 %v431_v27, %v422_v21  ;;  %v299_v1 = vmax.f32 %v2095_v63, 0.0  ;;  %v280_v5 = vld [vmem:[%s2427_s0 + $0x10] sm:$0xff]  ;;  %p1868_p2 = por %p1867_p1, %p1866_p0 }
  0x4f   : > { %1847 = vpow2.f32 %v337_v22  ;;  %v381_v10 = vadd.f32 1.0, %v380_v59  ;;  %v383_v63 = vand.u32 2147483647, %v2145_v4  ;;  %v451_v20 = vadd.f32 %v442_v0, %v280_v5  ;;  %v282_v59 = vld [vmem:[%s2427_s0 + $0x20] sm:$0xff] }
  0x50   : > { %v459_v36 = vpack.c.bf16 %v450_v51, %v450_v51  ;;  %v449_v53 = vadd.f32 %v440_v37, %v278_v23  ;;  %1849 = vlog2.f32 %v386_v43  ;;  %v389_v21 = vmul.f32 -0.5, %v2159_v25  ;;  %v281_v37 = vld [vmem:[%s2427_s0 + $0x18] sm:$0xff]  ;;  %p1869_p3 = pnand %p1868_p2, %p1862_p13 }
  0x51   : > { %v1842_v44 = vpop.eup %1841  ;;  %1851 = vpow2.f32 %v339_v56  ;;  %v382_v28 = vmul.f32 %v2145_v4, %v381_v10  ;;  %vm2232_vm11 = vcmp.lt.f32.partialorder %v383_v63, 0.0004427343  ;;  %v460_v34 = vpack.c.bf16 %v451_v20, %v451_v20 }
  0x52   : > { %v370_v58 = vmul.f32 0.6931472, %v1842_v44  ;;  %v458_v62 = vpack.c.bf16 %v449_v53, %v449_v53  ;;  %v300_v4 = vmax.f32 %v2101_v7, 0.0  ;;  %v392_v7 = vand.u32 2147483647, %v2159_v25 }
  0x53   : > { %vm1341_vm3 = vcmask 744448  }
  0x54   : > { %v376_v8 = vsel %vm2201_vm9, %v373_v9, %v370_v58  ;;  %vm2262_vm13 = vcmp.lt.f32.partialorder %v392_v7, 0.0004427343 }
  0x55   : > { %v425_v51 = vadd.f32 %v376_v8, %v299_v1 }
  0x5a   : > { %v2196_v60 = vpop.eup %1843 }
  0x5b   : > { %v395_v11 = vadd.f32 1.0, %v2196_v60  ;;  %v1846_v14 = vpop.eup %1845 }
  0x5c   : > { %v379_v27 = vmul.f32 0.6931472, %v1846_v14  ;;  %v2228_v30 = vpop.eup %1847 }
  0x5d   : > { %1853 = vlog2.f32 %v395_v11  ;;  %v404_v23 = vadd.f32 1.0, %v2228_v30  ;;  %v1850_v40 = vpop.eup %1849  ;;  %v407_v10 = vmul.f32 -0.5, %v2228_v30 }
  0x5e   : > { %v385_v38 = vsel %vm2232_vm11, %v382_v28, %v379_v27  ;;  %v2258_v55 = vpop.eup %1851 }
  0x5f   : > { %1855 = vlog2.f32 %v404_v23  ;;  %v408_v27 = vadd.f32 1.0, %v407_v10  ;;  %v416_v23 = vmul.f32 -0.5, %v2258_v55 }
  0x8e   : > { %v506_v26 = vpop.permute.xlu0 %505 }
  0x8f   : > { %v510_v33 = vpop.permute.xlu1 %509 }
  0x90   : > { %v526_v35 = vsel %vm518_vm4, %v510_v33, 0 }
  0x91   : > { %1703 = vmatpush3.bf16.msra.mxu1 %v526_v35 }
  0x92   : > { %v508_v39 = vpop.permute.xlu0 %507  ;;  %1708 = vmatprep.subr.bf16.mxu1 %v1922_v3 }
  0x93   : > { %v513_v57 = vsel %vm511_vm6, %v508_v39, %v510_v33  ;;  %v512_v45 = vsel %vm511_vm6, %v506_v26, %v508_v39  ;;  %v721_v52 = vpop.permute.xlu1 %720  ;;  %v434_v26 = vld [vmem:[%s2429_s2 + $0x18] sm:$0xff]  ;;  %v390_v39 = vadd.f32 1.0, %v389_v21  ;;  %vm1464_vm6 = vcmask 736256  }
  0x94   : > { %1654 = vmatprep.subr.msk.bf16.mxu0 %vm518_vm4, %v513_v57  ;;  %v520_v49 = vsel %vm518_vm4, %v512_v45, 0  ;;  %1705 = vmatmul.mubr.msk.bf16.vlgmr.msra.gmra.mxu1 %vm514_vm7, %v459_v36  ;;  %v443_v35 = vmul.f32 %v434_v26, %v425_v51  ;;  %v426_v45 = vadd.f32 %v385_v38, %v300_v4 }
  0x95   : > { %543 = vmatpush1.bf16.msra.mxu0 %v520_v49  ;;  %1709 = vmatpush3.bf16.msra.mxu1 %v619_v46  ;;  %v398_v46 = vmul.f32 -0.5, %v2196_v60  ;;  %v391_v53 = vmul.f32 %v2159_v25, %v390_v39  ;;  %v301_v25 = vmax.f32 %v2107_v18, 0.0  ;;  %v409_v39 = vmul.f32 %v2228_v30, %v408_v27 }
  0x96   : > { %1657 = vmatprep.subr.msk.bf16.mxu0 %vm518_vm4, %v2047_v13  ;;  %v723_v12 = vpop.permute.xlu0 %722  ;;  %1710 = vmatprep.mubr.msk.bf16.mxu1 %vm1923_vm0, %v1922_v3  ;;  %v452_v57 = vadd.f32 %v443_v35, %v281_v37  ;;  %v437_v37 = vld [vmem:[%s2429_s2 + $0x30] sm:$0xff] }
  0x97   : > { %1714 = vmatprep.subr.bf16.mxu1 %v1922_v3  ;;  %v725_v61 = vpop.permute.xlu1 %724  ;;  %v727_v16 = vsel %vm726_vm8, %v721_v52, %v723_v12  ;;  %v388_v52 = vmul.f32 0.6931472, %v1850_v40 }
  0x98   : > { %1655 = vmatmul.mubr.msk.bf16.vlgmr.msra.gmra.mxu0 %vm514_vm7, %v459_v36  ;;  %v728_v41 = vsel %vm726_vm8, %v723_v12, %v725_v61  ;;  %v739_v17 = vsel %vm518_vm4, %v725_v61, 0  ;;  %v733_v22 = vsel %vm518_vm4, %v727_v16, 0  ;;  %v461_v58 = vpack.c.bf16 %v452_v57, %v452_v57  ;;  %v436_v16 = vld [vmem:[%s2429_s2 + $0x28] sm:$0xff]  ;;  %v284_v57 = vld [vmem:[%s2427_s0 + $0x30] sm:$0xff] }
  0x99   : > { %636 = vmatpush1.bf16.msra.mxu0 %v613_v50  ;;  %653 = vmatprep.mubr.bf16.mxu0 %v1924_v6  ;;  %v435_v50 = vld [vmem:[%s2429_s2 + $0x20] sm:$0xff]  ;;  %v394_v13 = vsel %vm2262_vm13, %v391_v53, %v388_v52  ;;  %v399_v61 = vadd.f32 1.0, %v398_v46  ;;  %v417_v46 = vadd.f32 1.0, %v416_v23  ;;  %v419_v52 = vand.u32 2147483647, %v2258_v55 }
  0x9a   : > { %1660 = vmatprep.subr.msk.bf16.mxu0 %vm518_vm4, %v728_v41  ;;  %v844_v2 = vpop.permute.xlu0 %843  ;;  %v444_v9 = vmul.f32 %v435_v50, %v426_v45  ;;  %v413_v41 = vadd.f32 1.0, %v2258_v55  ;;  %v427_v8 = vadd.f32 %v394_v13, %v301_v25 }
  0x9b   : > { %v846_v19 = vpop.permute.xlu1 %845  ;;  %v400_v63 = vmul.f32 %v2196_v60, %v399_v61  ;;  %v418_v25 = vmul.f32 %v2258_v55, %v417_v46  ;;  %vm2343_vm5 = vcmp.lt.f32.partialorder %v419_v52, 0.0004427343  ;;  %v285_v55 = vld [vmem:[%s2427_s0 + $0x38] sm:$0xff] }
  0x9c   : > { %1711 = vmatmul.mubr.msk.bf16.vlgmr.msra.gmra.mxu1 %vm514_vm7, %v458_v62  ;;  %v850_v42 = vsel %vm849_vm10, %v844_v2, %v846_v19  ;;  %v401_v2 = vand.u32 2147483647, %v2196_v60  ;;  %v453_v5 = vadd.f32 %v444_v9, %v282_v59  ;;  %1857 = vlog2.f32 %v413_v41  ;;  %v283_v60 = vld [vmem:[%s2427_s0 + $0x28] sm:$0xff] }
  0x9d   : > { %1715 = vmatpush3.bf16.msra.mxu1 %v739_v17  ;;  %1716 = vmatprep.mubr.msk.bf16.mxu1 %vm1923_vm0, %v1922_v3  ;;  %v856_v47 = vsel %vm518_vm4, %v850_v42, 0 }
  0x9e   : > { %v848_v24 = vpop.permute.xlu0 %847  ;;  %1720 = vmatprep.subr.bf16.mxu1 %v1922_v3  ;;  %vm2290_vm15 = vcmp.lt.f32.partialorder %v401_v2, 0.0004427343  ;;  %v462_v21 = vpack.c.bf16 %v453_v5, %v453_v5 }
  0x9f   : > { %v851_v31 = vsel %vm849_vm10, %v846_v19, %v848_v24  ;;  %v967_v33 = vpop.permute.xlu1 %966  ;;  %v862_v43 = vsel %vm518_vm4, %v848_v24, 0  ;;  %v302_v24 = vmax.f32 %v2116_v29, 0.0 }
  0xa0   : > { %1658 = vmatmul.mubr.msk.bf16.vlgmr.msra.gmra.mxu0 %vm514_vm7, %v458_v62  ;;  %v1854_v62 = vpop.eup %1853 }
  0xa1   : > { %756 = vmatpush1.bf16.msra.mxu0 %v733_v22  ;;  %773 = vmatprep.mubr.bf16.mxu0 %v1924_v6  ;;  %v397_v17 = vmul.f32 0.6931472, %v1854_v62  ;;  %v445_v22 = vmul.f32 %v436_v16, %v427_v8  ;;  %v1856_v28 = vpop.eup %1855  ;;  %v304_v62 = vmax.f32 %v2155_v15, 0.0 }
  0xa2   : > { %1663 = vmatprep.subr.msk.bf16.mxu0 %vm518_vm4, %v851_v31  ;;  %v969_v36 = vpop.permute.xlu0 %968  ;;  %v406_v38 = vmul.f32 0.6931472, %v1856_v28 }
  0xa3   : > { %v971_v44 = vpop.permute.xlu1 %970  ;;  %v973_v0 = vsel %vm972_vm12, %v967_v33, %v969_v36  ;;  %v403_v26 = vsel %vm2290_vm15, %v400_v63, %v397_v17  ;;  %v410_v33 = vand.u32 2147483647, %v2228_v30  ;;  %v454_v29 = vadd.f32 %v445_v22, %v283_v60  ;;  %v286_v63 = vld [vmem:[%s2427_s0 + $0x40] sm:$0xff] }
  0xa4   : > { %1717 = vmatmul.mubr.msk.bf16.vlgmr.msra.gmra.mxu1 %vm514_vm7, %v460_v34  ;;  %v974_v56 = vsel %vm972_vm12, %v969_v36, %v971_v44  ;;  %v985_v1 = vsel %vm518_vm4, %v971_v44, 0  ;;  %v979_v11 = vsel %vm518_vm4, %v973_v0, 0  ;;  %v428_v35 = vadd.f32 %v403_v26, %v302_v24 }
  0xa5   : > { %1721 = vmatpush3.bf16.msra.mxu1 %v862_v43  ;;  %1722 = vmatprep.mubr.msk.bf16.mxu1 %vm1923_vm0, %v1922_v3  ;;  %vm2317_vm2 = vcmp.lt.f32.partialorder %v410_v33, 0.0004427343  ;;  %v463_v7 = vpack.c.bf16 %v454_v29, %v454_v29  ;;  %v303_v30 = vmax.f32 %v2138_v54, 0.0 }
  0xa6   : > { %v1090_v49 = vpop.permute.xlu0 %1089  ;;  %1726 = vmatprep.subr.bf16.mxu1 %v1922_v3  ;;  %v446_v44 = vmul.f32 %v437_v37, %v428_v35  ;;  %v412_v45 = vsel %vm2317_vm2, %v409_v39, %v406_v38 }
  0xa7   : > { %v1092_v48 = vpop.permute.xlu1 %1091 }
  0xa8   : > { %1661 = vmatmul.mubr.msk.bf16.vlgmr.msra.gmra.mxu0 %vm514_vm7, %v460_v34  ;;  %v1096_v31 = vsel %vm1095_vm14, %v1090_v49, %v1092_v48  ;;  %v455_v54 = vadd.f32 %v446_v44, %v284_v57 }
  0xa9   : > { %879 = vmatpush1.bf16.msra.mxu0 %v856_v47  ;;  %896 = vmatprep.mubr.bf16.mxu0 %v1924_v6  ;;  %v1102_v4 = vsel %vm518_vm4, %v1096_v31, 0  ;;  %v1858_v47 = vpop.eup %1857 }
  0xaa   : > { %1666 = vmatprep.subr.msk.bf16.mxu0 %vm518_vm4, %v974_v56  ;;  %v1094_v18 = vpop.permute.xlu0 %1093  ;;  %v429_v56 = vadd.f32 %v412_v45, %v303_v30  ;;  %v415_v9 = vmul.f32 0.6931472, %v1858_v47  ;;  %v464_v61 = vpack.c.bf16 %v455_v54, %v455_v54 }
  0xab   : > { %v1213_v14 = vpop.permute.xlu1 %1212  ;;  %v1097_v19 = vsel %vm1095_vm14, %v1092_v48, %v1094_v18  ;;  %v1108_v32 = vsel %vm518_vm4, %v1094_v18, 0 }
  0xac   : > { %1723 = vmatmul.mubr.msk.bf16.vlgmr.msra.gmra.mxu1 %vm514_vm7, %v461_v58  ;;  %v421_v0 = vsel %vm2343_vm5, %v418_v25, %v415_v9 }
  0xad   : > { %1727 = vmatpush3.bf16.msra.mxu1 %v985_v1  ;;  %1728 = vmatprep.mubr.msk.bf16.mxu1 %vm1923_vm0, %v1922_v3  ;;  %v430_v15 = vadd.f32 %v421_v0, %v304_v62 }
  0xae   : > { %1732 = vmatprep.subr.bf16.mxu1 %v1922_v3  ;;  %v1215_v51 = vpop.permute.xlu0 %1214 }
  0xaf   : > { %v1217_v34 = vpop.permute.xlu1 %1216  ;;  %v1219_v49 = vsel %vm1218_vm1, %v1213_v14, %v1215_v51 }
  0xb0   : > { %1664 = vmatmul.mubr.msk.bf16.vlgmr.msra.gmra.mxu0 %vm514_vm7, %v461_v58  ;;  %v1220_v40 = vsel %vm1218_vm1, %v1215_v51, %v1217_v34  ;;  %v1231_v50 = vsel %vm518_vm4, %v1217_v34, 0  ;;  %v1225_v12 = vsel %vm518_vm4, %v1219_v49, 0  ;;  %v438_v58 = vld [vmem:[%s2429_s2 + $0x38] sm:$0xff] }
  0xb1   : > { %1002 = vmatpush1.bf16.msra.mxu0 %v979_v11  ;;  %1019 = vmatprep.mubr.bf16.mxu0 %v1924_v6  ;;  %v447_v41 = vmul.f32 %v438_v58, %v429_v56  ;;  %v439_v11 = vld [vmem:[%s2429_s2 + $0x40] sm:$0xff] }
  0xb2   : > { %1669 = vmatprep.subr.msk.bf16.mxu0 %vm518_vm4, %v1097_v19  ;;  %v1336_v36 = vpop.permute.xlu0 %1335  ;;  %v448_v17 = vmul.f32 %v439_v11, %v430_v15 }
  0xb3   : > { %v1338_v43 = vpop.permute.xlu1 %1337  ;;  %v456_v8 = vadd.f32 %v447_v41, %v285_v55 }
  0xb4   : > { %1729 = vmatmul.mubr.msk.bf16.vlgmr.msra.gmra.mxu1 %vm514_vm7, %v462_v21  ;;  %v1342_v1 = vsel %vm1341_vm3, %v1336_v36, %v1338_v43  ;;  %v457_v51 = vadd.f32 %v448_v17, %v286_v63 }
  0xb5   : > { %1733 = vmatpush3.bf16.msra.mxu1 %v1108_v32  ;;  %1734 = vmatprep.mubr.msk.bf16.mxu1 %vm1923_vm0, %v1922_v3  ;;  %v1348_v10 = vsel %vm518_vm4, %v1342_v1, 0  ;;  %v465_v16 = vpack.c.bf16 %v456_v8, %v456_v8 }
  0xb6   : > { %1738 = vmatprep.subr.bf16.mxu1 %v1922_v3  ;;  %v1340_v53 = vpop.permute.xlu0 %1339  ;;  %v466_v22 = vpack.c.bf16 %v457_v51, %v457_v51 }
  0xb7   : > { %v1459_v48 = vpop.permute.xlu1 %1458  ;;  %v1343_v59 = vsel %vm1341_vm3, %v1338_v43, %v1340_v53  ;;  %v1354_v2 = vsel %vm518_vm4, %v1340_v53, 0 }
  0xb8   : > { %1667 = vmatmul.mubr.msk.bf16.vlgmr.msra.gmra.mxu0 %vm514_vm7, %v462_v21 }
  0xb9   : > { %1125 = vmatpush1.bf16.msra.mxu0 %v1102_v4  ;;  %1142 = vmatprep.mubr.bf16.mxu0 %v1924_v6 }
  0xba   : > { %1672 = vmatprep.subr.msk.bf16.mxu0 %vm518_vm4, %v1220_v40  ;;  %v1461_v18 = vpop.permute.xlu0 %1460 }
  0xbb   : > { %v1463_v5 = vpop.permute.xlu1 %1462  ;;  %v1465_v19 = vsel %vm1464_vm6, %v1459_v48, %v1461_v18 }
  0xbc   : > { %1735 = vmatmul.mubr.msk.bf16.vlgmr.msra.gmra.mxu1 %vm514_vm7, %v463_v7  ;;  %v1466_v14 = vsel %vm1464_vm6, %v1461_v18, %v1463_v5  ;;  %v1477_v20 = vsel %vm518_vm4, %v1463_v5, 0  ;;  %v1471_v21 = vsel %vm518_vm4, %v1465_v19, 0 }
  0xbd   : > { %1739 = vmatpush3.bf16.msra.mxu1 %v1231_v50  ;;  %1740 = vmatprep.mubr.msk.bf16.mxu1 %vm1923_vm0, %v1922_v3 }
  0xbe   : > { %1744 = vmatprep.subr.bf16.mxu1 %v1922_v3 }
  0xc0   : > { %1670 = vmatmul.mubr.msk.bf16.vlgmr.msra.gmra.mxu0 %vm514_vm7, %v463_v7 }
  0xc1   : > { %1248 = vmatpush1.bf16.msra.mxu0 %v1225_v12  ;;  %1265 = vmatprep.mubr.bf16.mxu0 %v1924_v6 }
  0xc2   : > { %1675 = vmatprep.subr.msk.bf16.mxu0 %vm518_vm4, %v1343_v59 }
  0xc4   : > { %1741 = vmatmul.mubr.msk.bf16.vlgmr.msra.gmra.mxu1 %vm514_vm7, %v464_v61 }
  0xc5   : > { %1745 = vmatpush3.bf16.msra.mxu1 %v1354_v2  ;;  %1746 = vmatprep.mubr.msk.bf16.mxu1 %vm1923_vm0, %v1922_v3 }
  0xc6   : > { %1750 = vmatprep.subr.bf16.mxu1 %v1922_v3 }
  0xc8   : > { %1673 = vmatmul.mubr.msk.bf16.vlgmr.msra.gmra.mxu0 %vm514_vm7, %v464_v61 }
  0xc9   : > { %1371 = vmatpush1.bf16.msra.mxu0 %v1348_v10  ;;  %1388 = vmatprep.mubr.bf16.mxu0 %v1924_v6 }
  0xca   : > { %1678 = vmatprep.subr.msk.bf16.mxu0 %vm518_vm4, %v1466_v14 }
  0xcc   : > { %1747 = vmatmul.mubr.msk.bf16.vlgmr.msra.gmra.mxu1 %vm514_vm7, %v465_v16 }
  0xcd   : > { %1751 = vmatpush3.bf16.msra.mxu1 %v1477_v20  ;;  %1752 = vmatprep.mubr.msk.bf16.mxu1 %vm1923_vm0, %v1922_v3  ;;  %vm1573_vm0 = vcmask 261120  }
  0xd0   : > { %1676 = vmatmul.mubr.msk.bf16.vlgmr.msra.gmra.mxu0 %vm514_vm7, %v465_v16 }
  0xd1   : > { %1494 = vmatpush1.bf16.msra.mxu0 %v1471_v21  ;;  %1511 = vmatprep.mubr.bf16.mxu0 %v1924_v6 }
  0xd4   : > { %1753 = vmatmul.mubr.msk.bf16.vlgmr.msra.gmra.mxu1 %vm514_vm7, %v466_v22 }
  0xd8   : > { %1679 = vmatmul.mubr.msk.bf16.vlgmr.msra.gmra.mxu0 %vm514_vm7, %v466_v22 }
 0x154   : > { %v603_v24 = vpop.f32.mrf.mxu1 }
 0x156   : > { %v1706_v60 = vpop.f32.mrf.mxu1 }
 0x158   : > { %v562_v26 = vpop.f32.mrf.mxu0  ;;  %v606_v27 = vpop.f32.mrf.mxu1 }
 0x15a   : > { %v564_v28 = vpop.f32.mrf.mxu0  ;;  %v1707_v31 = vpop.f32.mrf.mxu1 }
 0x15c   : > { %v566_v32 = vpop.f32.mrf.mxu0  ;;  %v696_v33 = vpop.f32.mrf.mxu1 }
 0x15d   : > { %v697_v5 = vadd.f32 %v696_v33, %v603_v24 }
 0x15e   : > { %v567_v34 = vpop.f32.mrf.mxu0  ;;  %v1712_v3 = vpop.f32.mrf.mxu1 }
 0x160   : > { %v655_v29 = vpop.f32.mrf.mxu0  ;;  %v699_v35 = vpop.f32.mrf.mxu1 }
 0x161   : > { %v656_v14 = vadd.f32 %v655_v29, %v562_v26 }
 0x162   : > { %v657_v4 = vpop.f32.mrf.mxu0  ;;  %v1713_v36 = vpop.f32.mrf.mxu1 }
 0x163   : > { %v658_v19 = vadd.f32 %v657_v4, %v564_v28 }
 0x164   : > { %v659_v37 = vpop.f32.mrf.mxu0  ;;  %v816_v6 = vpop.f32.mrf.mxu1 }
 0x165   : > { %v824_v10 = vadd.f32 %v816_v6, %v697_v5 }
 0x166   : > { %v660_v38 = vpop.f32.mrf.mxu0  ;;  %v1718_v39 = vpop.f32.mrf.mxu1 }
 0x168   : > { %v775_v23 = vpop.f32.mrf.mxu0  ;;  %v819_v40 = vpop.f32.mrf.mxu1 }
 0x169   : > { %v822_v20 = vadd.f32 %v775_v23, %v656_v14  ;;  %v1566_v23 = vpop.permute.xlu0 %1565 }
 0x16a   : > { %v777_v42 = vpop.f32.mrf.mxu0  ;;  %v1719_v43 = vpop.f32.mrf.mxu1 }
 0x16b   : > { %v823_v60 = vadd.f32 %v777_v42, %v658_v19 }
 0x16c   : > { %v779_v7 = vpop.f32.mrf.mxu0  ;;  %v939_v44 = vpop.f32.mrf.mxu1 }
 0x16d   : > { %v947_v17 = vadd.f32 %v939_v44, %v824_v10 }
 0x16e   : > { %v780_v30 = vpop.f32.mrf.mxu0  ;;  %v1724_v57 = vpop.f32.mrf.mxu1 }
 0x170   : > { %v898_v45 = vpop.f32.mrf.mxu0  ;;  %v942_v46 = vpop.f32.mrf.mxu1 }
 0x171   : > { %v945_v27 = vadd.f32 %v898_v45, %v822_v20 }
 0x172   : > { %v900_v47 = vpop.f32.mrf.mxu0  ;;  %v1725_v49 = vpop.f32.mrf.mxu1 }
 0x173   : > { %v946_v33 = vadd.f32 %v900_v47, %v823_v60 }
 0x174   : > { %v902_v50 = vpop.f32.mrf.mxu0  ;;  %v1062_v52 = vpop.f32.mrf.mxu1 }
 0x175   : > { %v1070_v21 = vadd.f32 %v1062_v52, %v947_v17 }
 0x176   : > { %v903_v53 = vpop.f32.mrf.mxu0  ;;  %v1730_v54 = vpop.f32.mrf.mxu1 }
 0x178   : > { %v1021_v56 = vpop.f32.mrf.mxu0  ;;  %v1065_v12 = vpop.f32.mrf.mxu1 }
 0x179   : > { %v1068_v34 = vadd.f32 %v1021_v56, %v945_v27 }
 0x17a   : > { %v1023_v48 = vpop.f32.mrf.mxu0  ;;  %v1731_v58 = vpop.f32.mrf.mxu1 }
 0x17b   : > { %v1069_v29 = vadd.f32 %v1023_v48, %v946_v33 }
 0x17c   : > { %v1025_v9 = vpop.f32.mrf.mxu0  ;;  %v1185_v25 = vpop.f32.mrf.mxu1 }
 0x17d   : > { %v1193_v32 = vadd.f32 %v1185_v25, %v1070_v21 }
 0x17e   : > { %v1026_v59 = vpop.f32.mrf.mxu0  ;;  %v1736_v13 = vpop.f32.mrf.mxu1 }
 0x180   : > { %v1144_v61 = vpop.f32.mrf.mxu0  ;;  %v1188_v41 = vpop.f32.mrf.mxu1 }
 0x181   : > { %v1191_v36 = vadd.f32 %v1144_v61, %v1068_v34 }
 0x182   : > { %v1146_v62 = vpop.f32.mrf.mxu0  ;;  %v1737_v55 = vpop.f32.mrf.mxu1 }
 0x183   : > { %v1192_v6 = vadd.f32 %v1146_v62, %v1069_v29 }
 0x184   : > { %v1148_v0 = vpop.f32.mrf.mxu0  ;;  %v1308_v1 = vpop.f32.mrf.mxu1 }
 0x185   : > { %v1316_v35 = vadd.f32 %v1308_v1, %v1193_v32 }
 0x186   : > { %v1149_v2 = vpop.f32.mrf.mxu0  ;;  %v1742_v18 = vpop.f32.mrf.mxu1 }
 0x188   : > { %v1267_v8 = vpop.f32.mrf.mxu0  ;;  %v1311_v15 = vpop.f32.mrf.mxu1 }
 0x189   : > { %v1314_v38 = vadd.f32 %v1267_v8, %v1191_v36 }
 0x18a   : > { %v1269_v11 = vpop.f32.mrf.mxu0  ;;  %v1743_v16 = vpop.f32.mrf.mxu1 }
 0x18b   : > { %v1315_v43 = vadd.f32 %v1269_v11, %v1192_v6 }
 0x18c   : > { %v1271_v63 = vpop.f32.mrf.mxu0  ;;  %v1431_v51 = vpop.f32.mrf.mxu1 }
 0x18d   : > { %v1439_v28 = vadd.f32 %v1431_v51, %v1316_v35 }
 0x18e   : > { %v1272_v22 = vpop.f32.mrf.mxu0  ;;  %v1748_v31 = vpop.f32.mrf.mxu1 }
 0x190   : > { %v1390_v24 = vpop.f32.mrf.mxu0  ;;  %v1434_v3 = vpop.f32.mrf.mxu1 }
 0x191   : > { %v1437_v7 = vadd.f32 %v1390_v24, %v1314_v38 }
 0x192   : > { %v1392_v26 = vpop.f32.mrf.mxu0  ;;  %v1749_v37 = vpop.f32.mrf.mxu1 }
 0x193   : > { %v1438_v45 = vadd.f32 %v1392_v26, %v1315_v43 }
 0x194   : > { %v1394_v4 = vpop.f32.mrf.mxu0  ;;  %v1554_v39 = vpop.f32.mrf.mxu1 }
 0x195   : > { %v1562_v40 = vadd.f32 %v1554_v39, %v1439_v28 }
 0x196   : > { %v1395_v42 = vpop.f32.mrf.mxu0  ;;  %v1754_v44 = vpop.f32.mrf.mxu1 }
 0x197   : > { %v1570_v30 = vadd.f32 %v1566_v23, %v1562_v40 }
 0x198   : > { %v1513_v57 = vpop.f32.mrf.mxu0  ;;  %v1557_v47 = vpop.f32.mrf.mxu1 }
 0x199   : > { %v1560_v46 = vadd.f32 %v1513_v57, %v1437_v7  ;;  %1574 = vst.msk [vmem:[%s271_s19 + $0x10] sm:$0xff] %vm1573_vm0, %v1570_v30 }
 0x19a   : > { %v1515_v49 = vpop.f32.mrf.mxu0  ;;  %v1755_v53 = vpop.f32.mrf.mxu1 }
 0x19b   : > { %v1568_v50 = vadd.f32 %v1566_v23, %v1560_v46  ;;  %v1561_v52 = vadd.f32 %v1515_v49, %v1438_v45 }
 0x19c   : > { %v1517_v54 = vpop.f32.mrf.mxu0 }
 0x19d   : > { %1571 = vst [vmem:[%s271_s19] sm:$0xff] %v1568_v50  ;;  %v1569_v56 = vadd.f32 %v1566_v23, %v1561_v52 }
 0x19e   : > { %v1518_v12 = vpop.f32.mrf.mxu0 }
 0x19f   : > { %1572 = vst [vmem:[%s271_s19 + $0x8] sm:$0xff] %v1569_v56 }
 0x1a0   : > { %1872 = shalt.err (!%p1869_p3)
}
 0x1a1   : > { %s1873_s14 = scalar_lea.hbm %s2390_s23, 384  ;;  %s1877_s17 = scalar_lea.hbm %s2434_s7, 768 }
 0x1a2   : > { %p1874_p4 = scmp.ne.s32.totalorder %s2390_s23, %s1873_s14  ;;  %p1878_p9 = scmp.lt.s32.totalorder %s2390_s23, %s2434_s7 }
 0x1a3   : > { %p1879_p10 = scmp.lt.s32.totalorder %s1877_s17, %s1873_s14 }
 0x1a4   : > { %p1875_p7 = pnand %p1874_p4, %p2012_p5 }
 0x1a5   : > { %p1880_p11 = por %p1879_p10, %p1878_p9 }
 0x1a6   : > { %p1876_p8 = pneg %p1875_p7 }
 0x1a8   : > { %p1881_p12 = pnand %p1880_p11, %p1876_p8 }
 0x1aa   : > { %1884 = shalt.err (!%p1881_p12)
}
 0x1ab   : > { %1759 = dma.vmem_to_hbm [thread:$0]  (%p2012_p5), %s1591_s20, 384, %s2390_s23, %s1576_s28  }
 0x1ac PF: > { %p1765_p13 = scmp.ge.s32.totalorder %s1919_s27, 2  ;;  %s1602_s21 = sand.u32 1, %s1907_s24  }
 0x1ad   : > { %s1603_s22 = scalar_lea.sflag [#allocation3], %s1602_s21 }
 0x1ae   : > { %p1762_p0 = pnand %p1765_p13, %p2016_p6 }
 0x1b0   : > { %p1763_p1 = pneg %p1762_p0 }
 0x1b2   : > { %1902 = dma.done.wait (%p1763_p1), %s1603_s22, 384  }
 0x1b3   : > { %1904 = vsyncadd (%p1763_p1), %s1603_s22, 4294966912  ;;  %p17_p2 = scmp.ge.s32.totalorder %s1999_s30, 4   ;;  %s2453_s24 = smov %s1911_s25 }
 0x1b4   : > { %s2454_s25 = smov %s1915_s26  ;;  %s2455_s26 = smov %s2010_s10 }
 0x1b5   : > { %s2456_s27 = smov %s1999_s30  ;;  %19 = sbr.rel (!%p17_p2) target bundleno = 3 (0x3), region = 83 }
 0x1ba   :  { %1608 = vsyncpa [#allocation3], 1 }
 0x1bb   :  { %1610 = vsyncpa [#allocation3 + $0x1], 1 }

</bundles_post_ra>
